<compile_context>
chip_gen: v7x
topology: tpu7x:2x2x1
jax: 0.10.0
libtpu: 0.0.40
codegen_flags: <defaults>
</compile_context>

<pallas_src>
import functools

import jax
import jax.numpy as jnp
from jax.experimental import pallas as pl
from jax.experimental.pallas import tpu as pltpu


# ---------------------------------------------------------------------------
# Fused kernel: causal conv1 + relu -> causal conv2 + relu -> (+res) -> relu
# ---------------------------------------------------------------------------
def _make_fused_kernel(*, K, dil, P, Lp, has_ds):
    def _causal_windows(v):
        """v: (C, Lp). Returns (K*C, Lp) where rows [k*C:(k+1)*C] are v shifted
        right by (P - k*dil) with zeros shifted in (causal left padding)."""
        c = v.shape[0]
        wins = []
        for k in range(K):                       # static tap loop (small K)
            s = P - k * dil                      # right-shift amount for tap k
            if s == 0:
                wins.append(v)
            else:
                pad = jnp.zeros((c, s), v.dtype)
                wins.append(jnp.concatenate([pad, v[:, :Lp - s]], axis=1))
        return jnp.concatenate(wins, axis=0)     # (K*C, Lp)

    def kernel(*refs):
        if has_ds:
            x_ref, w1_ref, b1_ref, w2_ref, b2_ref, wd_ref, bd_ref, o_ref = refs
        else:
            x_ref, w1_ref, b1_ref, w2_ref, b2_ref, o_ref = refs

        x = x_ref[0]                                            # (Cin, Lp), bf16

        # ---- conv1 + relu: one MXU matmul over stacked dilated taps --------
        s1 = _causal_windows(x)                                 # (K*Cin, Lp)
        h1 = jnp.dot(w1_ref[...], s1,
                     preferred_element_type=jnp.float32)        # (Cout, Lp) f32
        h1 = jnp.maximum(h1 + b1_ref[...], 0.0)

        # ---- conv2 + relu, fed straight from VMEM-resident h1 --------------
        s2 = _causal_windows(h1.astype(x.dtype))                # (K*Cout, Lp)
        h2 = jnp.dot(w2_ref[...], s2,
                     preferred_element_type=jnp.float32)        # (Cout, Lp) f32
        h2 = jnp.maximum(h2 + b2_ref[...], 0.0)

        # ---- residual (optional 1x1 conv) + final relu ----------------------
        if has_ds:
            res = jnp.dot(wd_ref[...], x,
                          preferred_element_type=jnp.float32) + bd_ref[...]
        else:
            res = x.astype(jnp.float32)                         # Cin == Cout

        o_ref[0] = jnp.maximum(h2 + res, 0.0).astype(o_ref.dtype)

    return kernel


# ---------------------------------------------------------------------------
# Wrapper
# ---------------------------------------------------------------------------
def temporal_block_forward(x, w1, b1, w2, b2, wd, bd, *, kernel_size, stride,
                           dilation, padding, compute_dtype=jnp.bfloat16):
    """x: (N, Cin, L) float32.  Returns (N, Cout, L) float32."""
    assert stride == 1, "TCN TemporalBlock with chomp is only causal for stride=1"
    assert padding == dilation * (kernel_size - 1), \
        "chomp==causal only when padding == dilation*(kernel_size-1)"
    N, Cin, L = x.shape
    Cout = w1.shape[0]
    K, dil, P = kernel_size, dilation, padding
    has_ds = wd is not None
    if not has_ds:
        assert Cin == Cout, "identity residual requires n_inputs == n_outputs"

    # Lane-dense time dimension (multiple of 128). Right zero-pad only; the
    # extra output columns never feed valid positions (causal) and are sliced off.
    LANE = 128
    Lp = max(LANE, ((L + LANE - 1) // LANE) * LANE)
    x_in = x if Lp == L else jnp.pad(x, ((0, 0), (0, 0), (0, Lp - L)))
    x_in = x_in.astype(compute_dtype)

    # Flatten taps into the contraction dim so stacked windows need one matmul:
    # w_flat[co, k*C + ci] = w[co, ci, k]
    w1f = jnp.transpose(w1, (0, 2, 1)).reshape(Cout, K * Cin).astype(compute_dtype)
    w2f = jnp.transpose(w2, (0, 2, 1)).reshape(Cout, K * Cout).astype(compute_dtype)
    b1c = b1.reshape(Cout, 1).astype(jnp.float32)
    b2c = b2.reshape(Cout, 1).astype(jnp.float32)

    in_specs = [
        pl.BlockSpec((1, Cin, Lp), lambda n: (n, 0, 0)),       # x (per-batch tile)
        pl.BlockSpec((Cout, K * Cin), lambda n: (0, 0)),       # w1 flat
        pl.BlockSpec((Cout, 1), lambda n: (0, 0)),             # b1
        pl.BlockSpec((Cout, K * Cout), lambda n: (0, 0)),      # w2 flat
        pl.BlockSpec((Cout, 1), lambda n: (0, 0)),             # b2
    ]
    args = [x_in, w1f, b1c, w2f, b2c]
    if has_ds:
        wdf = wd.reshape(Cout, Cin).astype(compute_dtype)      # 1x1 conv == matmul
        bdc = bd.reshape(Cout, 1).astype(jnp.float32)
        in_specs += [pl.BlockSpec((Cout, Cin), lambda n: (0, 0)),
                     pl.BlockSpec((Cout, 1), lambda n: (0, 0))]
        args += [wdf, bdc]

    kernel = _make_fused_kernel(K=K, dil=dil, P=P, Lp=Lp, has_ds=has_ds)

    y = pl.pallas_call(
        kernel,
        out_shape=jax.ShapeDtypeStruct((N, Cout, Lp), jnp.float32),
        grid=(N,),
        in_specs=in_specs,
        out_specs=pl.BlockSpec((1, Cout, Lp), lambda n: (n, 0, 0)),
        compiler_params=pltpu.CompilerParams(
            dimension_semantics=("parallel",),
            vmem_limit_bytes=32 * 1024 * 1024,
        ),
    )(*args)

    return y if Lp == L else y[:, :, :L]


# ---------------------------------------------------------------------------
# Parameter construction (deterministic, mirrors __init__ / init_weights)
# ---------------------------------------------------------------------------
def _apply_weight_norm(v):
    # nn.utils.weight_norm (dim=0): w = g * v / ||v||, with g initialized to ||v||.
    norm = jnp.sqrt(jnp.sum(v * v, axis=tuple(range(1, v.ndim)), keepdims=True))
    return norm * v / norm


def make_params(key, n_inputs, n_outputs, kernel_size):
    ks = jax.random.split(key, 6)
    v1 = 0.01 * jax.random.normal(ks[0], (n_outputs, n_inputs, kernel_size), jnp.float32)
    v2 = 0.01 * jax.random.normal(ks[1], (n_outputs, n_outputs, kernel_size), jnp.float32)
    w1 = _apply_weight_norm(v1)
    w2 = _apply_weight_norm(v2)
    bnd1 = 1.0 / (n_inputs * kernel_size) ** 0.5
    bnd2 = 1.0 / (n_outputs * kernel_size) ** 0.5
    b1 = jax.random.uniform(ks[2], (n_outputs,), jnp.float32, -bnd1, bnd1)
    b2 = jax.random.uniform(ks[3], (n_outputs,), jnp.float32, -bnd2, bnd2)
    if n_inputs != n_outputs:
        wd = 0.01 * jax.random.normal(ks[4], (n_outputs, n_inputs, 1), jnp.float32)
        bndd = 1.0 / n_inputs ** 0.5
        bd = jax.random.uniform(ks[5], (n_outputs,), jnp.float32, -bndd, bndd)
    else:
        wd, bd = None, None
    return w1, b1, w2, b2, wd, bd


# ---------------------------------------------------------------------------
# Pure-JAX reference (lax.conv, f32) for correctness check
# ---------------------------------------------------------------------------
def reference_forward(x, w1, b1, w2, b2, wd, bd, *, stride, padding, dilation):
    L = x.shape[-1]

    def conv(inp, w, b, pad, dil):
        y = jax.lax.conv_general_dilated(
            inp, w, window_strides=(stride,), padding=[(pad, pad)],
            rhs_dilation=(dil,), dimension_numbers=("NCH", "OIH", "NCH"))
        return y + b[None, :, None]

    h = jnp.maximum(conv(x, w1, b1, padding, dilation)[:, :, :L], 0.0)   # chomp
    h = jnp.maximum(conv(h, w2, b2, padding, dilation)[:, :, :L], 0.0)   # chomp
    res = conv(x, wd, bd, 0, 1) if wd is not None else x
    return jnp.maximum(h + res, 0.0)


# ---------------------------------------------------------------------------
if __name__ == "__main__":
    stride = 1
    kernel_size, dilation = 3, 2
    padding = (kernel_size - 1) * dilation
    N, L = 2, 16
    key = jax.random.PRNGKey(0)
    kx, kp = jax.random.split(key)

    fwd = jax.jit(functools.partial(
        temporal_block_forward, kernel_size=kernel_size, stride=stride,
        dilation=dilation, padding=padding))

    # Case 1: Cin != Cout  -> 1x1 downsample residual path.
    n_in, n_out = 4, 8
    x = jax.random.normal(kx, (N, n_in, L), jnp.float32)
    w1, b1, w2, b2, wd, bd = make_params(kp, n_in, n_out, kernel_size)
    y = jax.block_until_ready(fwd(x, w1, b1, w2, b2, wd, bd))
    y_ref = reference_forward(x, w1, b1, w2, b2, wd, bd,
                              stride=stride, padding=padding, dilation=dilation)
    assert y.shape == (N, n_out, L)
    assert jnp.allclose(y, y_ref, atol=2e-2, rtol=2e-2), "mismatch (downsample path)"

    # Case 2: Cin == Cout -> identity residual path (kernel variant without wd/bd).
    n_in2 = n_out2 = 8
    kx2, kp2 = jax.random.split(kp)
    x2 = jax.random.normal(kx2, (N, n_in2, L), jnp.float32)
    w1b, b1b, w2b, b2b, wdb, bdb = make_params(kp2, n_in2, n_out2, kernel_size)
    y2 = jax.block_until_ready(fwd(x2, w1b, b1b, w2b, b2b, wdb, bdb))
    y2_ref = reference_forward(x2, w1b, b1b, w2b, b2b, wdb, bdb,
                               stride=stride, padding=padding, dilation=dilation)
    assert y2.shape == (N, n_out2, L)
    assert jnp.allclose(y2, y2_ref, atol=2e-2, rtol=2e-2), "mismatch (identity path)"

    # Dropout layers are identity at inference time (eval mode) -> no-op here.
    print("KERNEL_OK")
</pallas_src>

<mosaic_0001>
module attributes {stable_mosaic.version = 11 : i64} {
  func.func @kernel(%arg0: i32, %arg1: memref<1x4x128xbf16, #tpu.memory_space<vmem>>, %arg2: memref<8x12xbf16, #tpu.memory_space<vmem>>, %arg3: memref<8x1xf32, #tpu.memory_space<vmem>>, %arg4: memref<8x24xbf16, #tpu.memory_space<vmem>>, %arg5: memref<8x1xf32, #tpu.memory_space<vmem>>, %arg6: memref<8x4xbf16, #tpu.memory_space<vmem>>, %arg7: memref<8x1xf32, #tpu.memory_space<vmem>>, %arg8: memref<1x8x128xf32, #tpu.memory_space<vmem>>) attributes {dimension_semantics = [#tpu.dimension_semantics<parallel>], iteration_bounds = array<i64: 2>, scalar_prefetch = 0 : i64, scratch_operands = 0 : i64, tpu.core_type = #tpu.core_type<tc>, window_params = [{transform_indices = @transform_0, window_bounds = array<i64: 1, 4, 128>}, {pipeline_mode = #tpu.pipeline_mode<synchronous>, transform_indices = @transform_1, window_bounds = array<i64: 8, 12>}, {pipeline_mode = #tpu.pipeline_mode<synchronous>, transform_indices = @transform_2, window_bounds = array<i64: 8, 1>}, {pipeline_mode = #tpu.pipeline_mode<synchronous>, transform_indices = @transform_3, window_bounds = array<i64: 8, 24>}, {pipeline_mode = #tpu.pipeline_mode<synchronous>, transform_indices = @transform_4, window_bounds = array<i64: 8, 1>}, {pipeline_mode = #tpu.pipeline_mode<synchronous>, transform_indices = @transform_5, window_bounds = array<i64: 8, 4>}, {pipeline_mode = #tpu.pipeline_mode<synchronous>, transform_indices = @transform_6, window_bounds = array<i64: 8, 1>}, {transform_indices = @transform_7, window_bounds = array<i64: 1, 8, 128>}]} {
    %c0 = arith.constant 0 : index
    %c0_0 = arith.constant 0 : index
    %c0_1 = arith.constant 0 : index
    %0 = vector.load %arg1[%c0, %c0_0, %c0_1] : memref<1x4x128xbf16, #tpu.memory_space<vmem>>, vector<1x4x128xbf16>
    %1 = vector.shape_cast %0 : vector<1x4x128xbf16> to vector<4x128xbf16>
    %cst = arith.constant 0.000000e+00 : bf16
    %2 = vector.broadcast %cst : bf16 to vector<4x4xbf16>
    %3 = vector.extract_strided_slice %1 {offsets = [0, 0], sizes = [4, 124], strides = [1, 1]} : vector<4x128xbf16> to vector<4x124xbf16>
    %4 = tpu.concatenate %2, %3 in 1 : vector<4x4xbf16>, vector<4x124xbf16> -> vector<4x128xbf16>
    %cst_2 = arith.constant 0.000000e+00 : bf16
    %5 = vector.broadcast %cst_2 : bf16 to vector<4x2xbf16>
    %6 = vector.extract_strided_slice %1 {offsets = [0, 0], sizes = [4, 126], strides = [1, 1]} : vector<4x128xbf16> to vector<4x126xbf16>
    %7 = tpu.concatenate %5, %6 in 1 : vector<4x2xbf16>, vector<4x126xbf16> -> vector<4x128xbf16>
    %8 = tpu.concatenate %4, %7, %1 in 0 : vector<4x128xbf16>, vector<4x128xbf16>, vector<4x128xbf16> -> vector<12x128xbf16>
    %c0_3 = arith.constant 0 : index
    %c0_4 = arith.constant 0 : index
    %9 = vector.load %arg2[%c0_3, %c0_4] : memref<8x12xbf16, #tpu.memory_space<vmem>>, vector<8x12xbf16>
    %cst_5 = arith.constant dense<0.000000e+00> : vector<8x128xf32>
    %10 = tpu.matmul %9, %8, %cst_5 {dimension_numbers = #tpu.dot_dimension_numbers<[1], [0], [0], [1], [0, 0, 1, 1], [], []>} : vector<8x12xbf16>, vector<12x128xbf16>, vector<8x128xf32> -> vector<8x128xf32>
    %c0_6 = arith.constant 0 : index
    %c0_7 = arith.constant 0 : index
    %11 = vector.load %arg3[%c0_6, %c0_7] : memref<8x1xf32, #tpu.memory_space<vmem>>, vector<8x1xf32>
    %12 = vector.broadcast %11 : vector<8x1xf32> to vector<8x128xf32>
    %13 = arith.addf %10, %12 : vector<8x128xf32>
    %cst_8 = arith.constant 0.000000e+00 : f32
    %14 = vector.broadcast %cst_8 : f32 to vector<8x128xf32>
    %15 = arith.maximumf %13, %14 : vector<8x128xf32>
    %16 = arith.truncf %15 : vector<8x128xf32> to vector<8x128xbf16>
    %cst_9 = arith.constant 0.000000e+00 : bf16
    %17 = vector.broadcast %cst_9 : bf16 to vector<8x4xbf16>
    %18 = vector.extract_strided_slice %16 {offsets = [0, 0], sizes = [8, 124], strides = [1, 1]} : vector<8x128xbf16> to vector<8x124xbf16>
    %19 = tpu.concatenate %17, %18 in 1 : vector<8x4xbf16>, vector<8x124xbf16> -> vector<8x128xbf16>
    %cst_10 = arith.constant 0.000000e+00 : bf16
    %20 = vector.broadcast %cst_10 : bf16 to vector<8x2xbf16>
    %21 = vector.extract_strided_slice %16 {offsets = [0, 0], sizes = [8, 126], strides = [1, 1]} : vector<8x128xbf16> to vector<8x126xbf16>
    %22 = tpu.concatenate %20, %21 in 1 : vector<8x2xbf16>, vector<8x126xbf16> -> vector<8x128xbf16>
    %23 = tpu.concatenate %19, %22, %16 in 0 : vector<8x128xbf16>, vector<8x128xbf16>, vector<8x128xbf16> -> vector<24x128xbf16>
    %c0_11 = arith.constant 0 : index
    %c0_12 = arith.constant 0 : index
    %24 = vector.load %arg4[%c0_11, %c0_12] : memref<8x24xbf16, #tpu.memory_space<vmem>>, vector<8x24xbf16>
    %cst_13 = arith.constant dense<0.000000e+00> : vector<8x128xf32>
    %25 = tpu.matmul %24, %23, %cst_13 {dimension_numbers = #tpu.dot_dimension_numbers<[1], [0], [0], [1], [0, 0, 1, 1], [], []>} : vector<8x24xbf16>, vector<24x128xbf16>, vector<8x128xf32> -> vector<8x128xf32>
    %c0_14 = arith.constant 0 : index
    %c0_15 = arith.constant 0 : index
    %26 = vector.load %arg5[%c0_14, %c0_15] : memref<8x1xf32, #tpu.memory_space<vmem>>, vector<8x1xf32>
    %27 = vector.broadcast %26 : vector<8x1xf32> to vector<8x128xf32>
    %28 = arith.addf %25, %27 : vector<8x128xf32>
    %cst_16 = arith.constant 0.000000e+00 : f32
    %29 = vector.broadcast %cst_16 : f32 to vector<8x128xf32>
    %30 = arith.maximumf %28, %29 : vector<8x128xf32>
    %c0_17 = arith.constant 0 : index
    %c0_18 = arith.constant 0 : index
    %31 = vector.load %arg6[%c0_17, %c0_18] : memref<8x4xbf16, #tpu.memory_space<vmem>>, vector<8x4xbf16>
    %cst_19 = arith.constant dense<0.000000e+00> : vector<8x128xf32>
    %32 = tpu.matmul %31, %1, %cst_19 {dimension_numbers = #tpu.dot_dimension_numbers<[1], [0], [0], [1], [0, 0, 1, 1], [], []>} : vector<8x4xbf16>, vector<4x128xbf16>, vector<8x128xf32> -> vector<8x128xf32>
    %c0_20 = arith.constant 0 : index
    %c0_21 = arith.constant 0 : index
    %33 = vector.load %arg7[%c0_20, %c0_21] : memref<8x1xf32, #tpu.memory_space<vmem>>, vector<8x1xf32>
    %34 = vector.broadcast %33 : vector<8x1xf32> to vector<8x128xf32>
    %35 = arith.addf %32, %34 : vector<8x128xf32>
    %36 = arith.addf %30, %35 : vector<8x128xf32>
    %cst_22 = arith.constant 0.000000e+00 : f32
    %37 = vector.broadcast %cst_22 : f32 to vector<8x128xf32>
    %38 = arith.maximumf %36, %37 : vector<8x128xf32>
    %c0_23 = arith.constant 0 : index
    %c0_24 = arith.constant 0 : index
    %c0_25 = arith.constant 0 : index
    %39 = vector.load %arg8[%c0_23, %c0_24, %c0_25] : memref<1x8x128xf32, #tpu.memory_space<vmem>>, vector<1x8x128xf32>
    %40 = vector.shape_cast %39 : vector<1x8x128xf32> to vector<8x128xf32>
    %41 = vector.shape_cast %38 : vector<8x128xf32> to vector<1x8x128xf32>
    tpu.vector_store %arg8[%c0_23, %c0_24, %c0_25], %41 {strides = array<i32>} : memref<1x8x128xf32, #tpu.memory_space<vmem>>, vector<1x8x128xf32>,
    return
  }
  func.func @transform_0(%arg0: i32) -> (i32, i32, i32) {
    %c0_i32 = arith.constant 0 : i32
    %c0_i32_0 = arith.constant 0 : i32
    %c0_i32_1 = arith.constant 0 : i32
    return %arg0, %c0_i32, %c0_i32_0 : i32, i32, i32
  }
  func.func @transform_1(%arg0: i32) -> (i32, i32) {
    %c0_i32 = arith.constant 0 : i32
    %c0_i32_0 = arith.constant 0 : i32
    %c0_i32_1 = arith.constant 0 : i32
    return %c0_i32, %c0_i32_0 : i32, i32
  }
  func.func @transform_2(%arg0: i32) -> (i32, i32) {
    %c0_i32 = arith.constant 0 : i32
    %c0_i32_0 = arith.constant 0 : i32
    %c0_i32_1 = arith.constant 0 : i32
    return %c0_i32, %c0_i32_0 : i32, i32
  }
  func.func @transform_3(%arg0: i32) -> (i32, i32) {
    %c0_i32 = arith.constant 0 : i32
    %c0_i32_0 = arith.constant 0 : i32
    %c0_i32_1 = arith.constant 0 : i32
    return %c0_i32, %c0_i32_0 : i32, i32
  }
  func.func @transform_4(%arg0: i32) -> (i32, i32) {
    %c0_i32 = arith.constant 0 : i32
    %c0_i32_0 = arith.constant 0 : i32
    %c0_i32_1 = arith.constant 0 : i32
    return %c0_i32, %c0_i32_0 : i32, i32
  }
  func.func @transform_5(%arg0: i32) -> (i32, i32) {
    %c0_i32 = arith.constant 0 : i32
    %c0_i32_0 = arith.constant 0 : i32
    %c0_i32_1 = arith.constant 0 : i32
    return %c0_i32, %c0_i32_0 : i32, i32
  }
  func.func @transform_6(%arg0: i32) -> (i32, i32) {
    %c0_i32 = arith.constant 0 : i32
    %c0_i32_0 = arith.constant 0 : i32
    %c0_i32_1 = arith.constant 0 : i32
    return %c0_i32, %c0_i32_0 : i32, i32
  }
  func.func @transform_7(%arg0: i32) -> (i32, i32, i32) {
    %c0_i32 = arith.constant 0 : i32
    %c0_i32_0 = arith.constant 0 : i32
    %c0_i32_1 = arith.constant 0 : i32
    return %arg0, %c0_i32, %c0_i32_0 : i32, i32, i32
  }
}

</mosaic_0001>

<bundles_post_ra>
// kernel: temporal_block_forward.1
= control target key start
LH: loop header
LB: loop body
LE: loop exit
PB: predicated region body
PF: predicated region fallthrough
CT: control target
= control target key end

     0   :  { %12 = vsyncpa [#allocation3], 0  ;;  %s898_s0 = inlined_call_operand.vmem [shape: bf16[2,4,128], index: 0, kind: input, shape index: {}]   ;;  %s899_s1 = inlined_call_operand.vmem [shape: bf16[8,12], index: 1, kind: input, shape index: {}]   ;;  %s900_s2 = inlined_call_operand.vmem [shape: f32[8,1], index: 2, kind: input, shape index: {}]   ;;  %s901_s3 = inlined_call_operand.vmem [shape: bf16[8,24], index: 3, kind: input, shape index: {}]   ;;  %s902_s4 = inlined_call_operand.vmem [shape: f32[8,1], index: 4, kind: input, shape index: {}]   ;;  %s903_s5 = inlined_call_operand.vmem [shape: bf16[8,4], index: 5, kind: input, shape index: {}]   ;;  %s904_s6 = inlined_call_operand.vmem [shape: f32[8,1], index: 6, kind: input, shape index: {}]   ;;  %s905_s7 = inlined_call_operand.hbm [shape: f32[2,8,128], index: 7, kind: output, shape index: {}]  }
   0x1   :  { %14 = vsyncpa [#allocation3 + $0x1], 0  ;;  %s756_s24 = smov 0   ;;  %s758_s25 = smov 0  }
   0x2   :  { %s760_s26 = smov 0   ;;  %s762_s27 = smov 0  }
   0x3 LB: > { %s777_s28 = sadd.s32 4294967295, %s707_s27   ;;  %s558_s29 = sadd.s32 4294967294, %s707_s27   ;;  %s707_s27 = sphi %s762_s27, %s911_s27   ;;  %s703_s26 = sphi %s760_s26, %s910_s26   ;;  %s699_s25 = sphi %s758_s25, %s909_s25   ;;  %s695_s24 = sphi %s756_s24, %s908_s24  }
   0x4   : > { %s781_s30 = sadd.s32 1, %s707_s27   ;;  %s179_s8 = sadd.s32 1, %s703_s26 }
   0x5   : > { %s176_s9 = ssub.s32 %s707_s27, %s781_s30  ;;  %p189_p0 = scmp.ne.s32.totalorder %s703_s26, %s699_s25 }
   0x6   : > { %p177_p1 = scmp.eq.s32.totalorder %s176_s9, 0  ;;  %p190_p2 = scmp.eq.s32.totalorder %s777_s28, 1 }
   0x7   : > { %p195_p3 = scmp.ne.s32.totalorder %s699_s25, %s695_s24  ;;  %p196_p4 = scmp.eq.s32.totalorder %s558_s29, 1 }
   0x8   : > { %s792_s10 = scalar_select %p177_p1, %s703_s26, %s179_s8  }
   0x9   : > { %p794_p5 = por %p190_p2, %p189_p0  ;;  %p798_p6 = por %p196_p4, %p195_p3 }
   0xa   : > { %p561_p7 = scmp.ge.s32.totalorder %s707_s27, 1  ;;  %p239_p8 = scmp.lt.s32.totalorder %s707_s27, 3 }
   0xc   : > { %p240_p9 = pnand %p561_p7, %p239_p8 }
   0xd   : > { %p270_p10 = scmp.lt.s32.totalorder (!%p240_p9), %s777_s28, 1  ;;  %v280_v0 = vlaneseq (!%p240_p9)  ;;  %v709_v1 = vmov (!%p240_p9), 1983009808   ;;  %v710_v4 = vmov (!%p240_p9), 0.0   ;;  %vm711_vm0 = vmmov (!%p240_p9), 0   ;;  %v305_v9 = vld [vmem:[%s900_s2] sm:$0xff] (!%p240_p9) }
   0xe   : > { %243 = sbr.rel (%p240_p9) target bundleno = 732 (0x2dc), region = 48  ;;  %v278_v2 = vunpack.c.l.s4 (!%p240_p9), %v709_v1  ;;  %578 = vmatprep.subr.bf16.mxu0 (!%p240_p9), %v710_v4  ;;  %584 = vmatprep.subr.bf16.mxu1 (!%p240_p9), %v710_v4  ;;  %v712_v10 = vmov (!%p240_p9), 0   ;;  %s713_s20 = smov (!%p240_p9), 2   ;;  %vm292_vm1 = vcmask (!%p240_p9), 15360   ;;  %vm286_vm2 = vcmask (!%p240_p9), 31744   ;;  %v375_v31 = vld [vmem:[%s902_s4] sm:$0xff] (!%p240_p9) }
   0xf   : > { %v281_v3 = vshrl.u32 (!%p240_p9), %v280_v0, 7  ;;  %580 = vmatprep.mubr.msk.bf16.mxu0 (!%p240_p9), %vm711_vm0, %v710_v4  ;;  %588 = vmatprep.mubr.msk.bf16.mxu1 (!%p240_p9), %vm711_vm0, %v710_v4  ;;  %s714_s21 = smov (!%p240_p9), 4   ;;  %vm298_vm3 = vcmask (!%p240_p9), 1041408   ;;  %vm301_vm4 = vcmask (!%p240_p9), 1043456   ;;  %vm315_vm5 = vcmask (!%p240_p9), 1045504   ;;  %v430_v32 = vld [vmem:[%s904_s6] sm:$0xff] (!%p240_p9) }
  0x10   : > { %v279_v5 = vunpack.c.0.s8 (!%p240_p9), %v278_v2  ;;  %643 = vset.pattern.permute.xlu1 (!%p240_p9), %v712_v10  ;;  %644 = vset.pattern.permute.xlu0 (!%p240_p9), %v712_v10  ;;  %v304_v20 = vld [vmem:[%s899_s1] sm:$0xf] (!%p240_p9)  ;;  %vm311_vm6 = vcmask (!%p240_p9), 97280   ;;  %vm381_vm7 = vcmask (!%p240_p9), 195584   ;;  %s267_s18 = sand.u32 (!%p240_p9), 1, %s699_s25  }
  0x11   : > { %308 = vperm.xlu1 (!%p240_p9), %643, %v305_v9   ;;  %v429_v27 = vld [vmem:[%s903_s5] sm:$0xf] (!%p240_p9)  ;;  %s562_s19 = sshll.u32 (!%p240_p9), %s267_s18, 3  ;;  %s486_s9 = scalar_lea.sflag (!%p240_p9), [#allocation3], %s267_s18 }
  0x12   : > { %v282_v6 = vsub.s32 (!%p240_p9), %v279_v5, %v281_v3  ;;  %v374_v40 = vld [vmem:[%s901_s3] sm:$0xf] (!%p240_p9) }
  0x15   : > { %s271_s13 = scalar_select %p270_p10, %s777_s28, 1 }
  0x17   : > { %s563_s14 = sshll.u32 %s271_s13, 1 }
  0x18   : > { %s273_s17 = scalar_lea.vmem %s898_s0, %s563_s14 }
  0x19   : > { %v275_v7 = vld [vmem:[%s273_s17] sm:$0x3] }
  0x1a   : > { %v283_v8 = vrot.slane %v275_v7, %v282_v6  ;;  %v440_v22 = vsel %vm298_vm3, %v275_v7, 0 }
  0x1c   : > { %290 = vrot.lane.b32.xlu0 %v283_v8, %s713_s20  ;;  %v297_v13 = vcombine.low %v283_v8, %v283_v8 }
  0x20   : > { %284 = vrot.lane.b32.xlu0 %v283_v8, %s714_s21 }
  0x8e   : > { %v291_v11 = vpop.permute.xlu0 %290 }
  0x8f   : > { %v294_v12 = vsel %vm292_vm1, 0, %v291_v11 }
  0x90   : > { %v296_v14 = vrot.slane %v294_v12, 6  ;;  %v309_v21 = vpop.permute.xlu1 %308 }
  0x92   : > { %v285_v15 = vpop.permute.xlu0 %284 }
  0x93   : > { %v289_v16 = vsel %vm286_vm2, 0, %v285_v15 }
  0x94   : > { %v300_v17 = vsel %vm298_vm3, %v289_v16, %v296_v14 }
  0x95   : > { %v303_v18 = vsel %vm301_vm4, %v300_v17, %v297_v13 }
  0x96   : > { %v316_v19 = vsel %vm315_vm5, %v303_v18, 0 }
  0x97   : > { %579 = vmatpush3.bf16.msra.mxu0 %v316_v19 }
  0x98   : > { %592 = vmatprep.subr.bf16.mxu0 %v710_v4 }
  0x9a   : > { %581 = vmatmul.mubr.msk.bf16.vlgmr.msra.gmra.mrb[0].mxu0 %vm311_vm6, %v304_v20 }
  0x9b   : > { %594 = vmatprep.mubr.msk.bf16.mxu0 %vm711_vm0, %v710_v4  ;;  %593 = vmatpush3.bf16.msra.mxu0 %v440_v22 }
  0xa2   : > { %595 = vmatmul.mubr.msk.bf16.vlgmr.msra.gmra.mrb[4].mxu0 %vm286_vm2, %v429_v27 }
 0x16d   : > { %v352_v23 = vpop.f32.mrb[0].mxu0 }
 0x16e   : > { %v353_v24 = vadd.f32 %v352_v23, %v309_v21  ;;  %v582_v25 = vpop.f32.mrb[1].mxu0 }
 0x16f   : > { %v355_v26 = vpop.f32.mrb[2].mxu0 }
 0x170   : > { %v358_v28 = vmax.f32 %v353_v24, 0.0  ;;  %v583_v29 = vpop.f32.mrb[3].mxu0 }
 0x172   : > { %v359_v30 = vpack.c.bf16 %v358_v28, %v358_v28 }
 0x174   : > { %361 = vrot.lane.b32.xlu0 %v359_v30, %s714_s21  ;;  %365 = vrot.lane.b32.xlu1 %v359_v30, %s713_s20  ;;  %v386_v39 = vsel %vm301_vm4, %v359_v30, 0  ;;  %s568_s20 = sshll.u32 %s777_s28, 7  ;;  %s269_s21 = scalar_lea.vmem [#allocation2], %s562_s19 }
 0x175   : > { %v476_v41 = vpop.f32.mrb[4].mxu0  ;;  %s499_s22 = sshll.u32 %s269_s21, 4  ;;  %s856_s8 = scalar_lea.hbm %s905_s7, %s568_s20  ;;  %s858_s22 = int_to_ptr.vmem [resolvable:$true] %s499_s22 }
 0x176   : > { %v596_v42 = vpop.f32.mrb[5].mxu0  ;;  %s645_s13 = scalar_lea.vmem %s858_s22, 128  ;;  %s715_s28 = smov [#allocation2]  }
 0x177   : > { %v479_v43 = vpop.f32.mrb[6].mxu0  ;;  %p646_p11 = scmp.ne.s32.totalorder %s858_s22, %s645_s13  ;;  %s649_s14 = sshll.u32 %s715_s28, 4  ;;  %s650_s14 = int_to_ptr.vmem [resolvable:$false] %s649_s14 }
 0x178   : > { %378 = vperm.xlu1 %643, %v375_v31   ;;  %433 = vperm.xlu0 %644, %v430_v32   ;;  %v597_v44 = vpop.f32.mrb[7].mxu0  ;;  %s651_s15 = scalar_lea.vmem %s650_s14, 256  ;;  %p652_p0 = scmp.lt.s32.totalorder %s858_s22, %s650_s14 }
 0x179   : > { %p647_p12 = pnand %p646_p11, %p794_p5  ;;  %p653_p1 = scmp.lt.s32.totalorder %s651_s15, %s645_s13 }
 0x17b   : > { %p648_p13 = pneg %p647_p12  ;;  %p654_p2 = por %p653_p1, %p652_p0 }
 0x17d   : > { %p655_p3 = pnand %p654_p2, %p648_p13 }
 0x1e6   : > { %v362_v33 = vpop.permute.xlu0 %361  ;;  %v366_v34 = vpop.permute.xlu1 %365 }
 0x1e7   : > { %v368_v35 = vsel %vm292_vm1, 0, %v366_v34  ;;  %v364_v37 = vsel %vm286_vm2, 0, %v362_v33 }
 0x1e8   : > { %v370_v36 = vrot.slane %v368_v35, 4 }
 0x1ea   : > { %v372_v38 = vsel %vm301_vm4, %v364_v37, %v370_v36 }
 0x1eb   : > { %585 = vmatpush3.bf16.msra.mxu1 %v372_v38 }
 0x1ec   : > { %586 = vmatprep.subr.bf16.mxu1 %v710_v4 }
 0x1ef   : > { %587 = vmatpush3.bf16.msra.mxu1 %v386_v39 }
 0x1f2   : > { %589 = vmatmul.mubr.msk.bf16.vlgmr.msra.gmra.mrb[0].mxu1 %vm381_vm7, %v374_v40 }
 0x1f7   : > { %v434_v45 = vpop.permute.xlu0 %433  ;;  %v379_v46 = vpop.permute.xlu1 %378 }
 0x1f8   : > { %v477_v50 = vadd.f32 %v476_v41, %v434_v45 }
 0x2c5   : > { %v422_v47 = vpop.f32.mrb[0].mxu1 }
 0x2c6   : > { %v423_v48 = vadd.f32 %v422_v47, %v379_v46  ;;  %v590_v49 = vpop.f32.mrb[1].mxu1 }
 0x2c7   : > { %v425_v51 = vpop.f32.mrb[2].mxu1 }
 0x2c8   : > { %v428_v52 = vmax.f32 %v423_v48, 0.0  ;;  %v591_v53 = vpop.f32.mrb[3].mxu1 }
 0x2ca   : > { %v482_v54 = vadd.f32 %v477_v50, %v428_v52 }
 0x2cc   : > { %v483_v55 = vmax.f32 %v482_v54, 0.0 }
 0x2ce   : > { %484 = vst [vmem:[%s269_s21] sm:$0xff] %v483_v55 }
 0x2cf   : > { %658 = shalt.err (!%p655_p3)
}
 0x2d0   : > { %s659_s16 = scalar_lea.hbm %s856_s8, 128  ;;  %s663_s19 = scalar_lea.hbm %s905_s7, 256 }
 0x2d1   : > { %p660_p4 = scmp.ne.s32.totalorder %s856_s8, %s659_s16  ;;  %p664_p9 = scmp.lt.u32.totalorder %s856_s8, %s905_s7 }
 0x2d2   : > { %p665_p10 = scmp.lt.u32.totalorder %s663_s19, %s659_s16  ;;  %p667_p12 = scmp.lt.u32.totalorder %s659_s16, %s856_s8 }
 0x2d3   : > { %p661_p7 = pnand %p660_p4, %p794_p5 }
 0x2d4   : > { %p666_p11 = por %p665_p10, %p664_p9 }
 0x2d5   : > { %p662_p8 = pneg %p661_p7 }
 0x2d6   : > { %p668_p13 = por %p667_p12, %p666_p11 }
 0x2d8   : > { %p669_p0 = pnand %p668_p13, %p662_p8 }
 0x2da   : > { %672 = shalt.err (!%p669_p0)
}
 0x2db   : > { %598 = dma.vmem_to_hbm [thread:$0]  (%p794_p5), %s858_s22, 128, %s856_s8, %s486_s9  }
 0x2dc PF: > { %p604_p1 = scmp.ge.s32.totalorder %s707_s27, 2  ;;  %s511_s23 = sand.u32 1, %s695_s24  }
 0x2dd   : > { %s512_s29 = scalar_lea.sflag [#allocation3], %s511_s23 }
 0x2de   : > { %p601_p2 = pnand %p604_p1, %p798_p6 }
 0x2e0   : > { %690 = dma.done.wait (!%p601_p2), %s512_s29, 128  }
 0x2e1   : > { %692 = vsyncadd (!%p601_p2), %s512_s29, 4294967168  ;;  %p17_p3 = scmp.ge.s32.totalorder %s781_s30, 4   ;;  %s908_s24 = smov %s699_s25 }
 0x2e2   : > { %s909_s25 = smov %s703_s26  ;;  %s910_s26 = smov %s792_s10 }
 0x2e3   : > { %s911_s27 = smov %s781_s30  ;;  %19 = sbr.rel (!%p17_p3) target bundleno = 3 (0x3), region = 83 }
 0x2ea   :  { %517 = vsyncpa [#allocation3], 1 }
 0x2eb   :  { %519 = vsyncpa [#allocation3 + $0x1], 1 }

</bundles_post_ra>
